<compile_context>
chip_gen: v7x
topology: tpu7x:2x2x1
jax: 0.10.0
libtpu: 0.0.40
codegen_flags: <defaults>
</compile_context>

<pallas_src>
import functools

import jax
import jax.numpy as jnp
from jax import lax
from jax.experimental import pallas as pl
from jax.experimental.pallas import tpu as pltpu


_LANES = 128
_SUBLANES = 8


def _detect_tpu_generation():
    try:
        kind = jax.devices()[0].device_kind.lower()
    except Exception:
        return None
    for g in (7, 6, 5, 4, 3, 2):
        if (f"v{g}" in kind) or (f"tpu{g}" in kind) or (f"tpu {g}" in kind):
            return g
    return None


_TPU_GEN = _detect_tpu_generation()


def _make_loss_kernel(sub_rows: int, n_sub: int, unroll: int, compute_l1: bool):
    """Kernel over one (tile_rows, 128) block per input.

    Iterates the block in (sub_rows, 128) vreg-sized slices with a fori_loop,
    accumulating sum(d*d) (and sum(|d|) when compute_l1) into vreg-shaped
    carries, then adds them into the resident output block.
    """

    def kernel(pred_ref, true_ref, *out_refs):
        i = pl.program_id(1)

        @pl.when(i == 0)
        def _init():
            for r in out_refs:
                r[...] = jnp.zeros_like(r)

        def body(j, carry):
            off = pl.multiple_of(j * sub_rows, sub_rows)
            p = pred_ref[pl.ds(off, sub_rows), :].astype(jnp.float32)
            t = true_ref[pl.ds(off, sub_rows), :].astype(jnp.float32)
            d = p - t
            if compute_l1:
                acc_sq, acc_ab = carry
                return (acc_sq + d * d, acc_ab + jnp.abs(d))
            return carry + d * d

        zero = jnp.zeros((sub_rows, _LANES), jnp.float32)
        init = (zero, zero) if compute_l1 else zero
        acc = lax.fori_loop(0, n_sub, body, init, unroll=unroll)

        if compute_l1:
            out_refs[0][0] = out_refs[0][0] + acc[0]
            out_refs[1][0] = out_refs[1][0] + acc[1]
        else:
            out_refs[0][0] = out_refs[0][0] + acc

    return kernel


def _reduce_sums(pred2d, true2d, *, tile_rows, sub_rows, n_inner, num_splits,
                 compute_l1, vmem_limit):
    n_sub = tile_rows // sub_rows
    unroll = max(1, min(8, n_sub))
    kernel = _make_loss_kernel(sub_rows, n_sub, unroll, compute_l1)

    def in_map(c, i):
        return (c * n_inner + i, 0)

    n_out = 2 if compute_l1 else 1
    out_shape = tuple(
        jax.ShapeDtypeStruct((num_splits, sub_rows, _LANES), jnp.float32)
        for _ in range(n_out))
    out_specs = tuple(
        pl.BlockSpec((1, sub_rows, _LANES), lambda c, i: (c, 0, 0))
        for _ in range(n_out))

    return pl.pallas_call(
        kernel,
        out_shape=out_shape,
        grid_spec=pltpu.PrefetchScalarGridSpec(
            num_scalar_prefetch=0,
            grid=(num_splits, n_inner),
            in_specs=[
                pl.BlockSpec((tile_rows, _LANES), in_map),
                pl.BlockSpec((tile_rows, _LANES), in_map),
            ],
            out_specs=out_specs,
        ),
        compiler_params=pltpu.CompilerParams(
            # On v7x the leading axis (2 halves) shards across the 2 TCs;
            # on single-TC chips num_splits == 1 so it is a trivial loop.
            dimension_semantics=("parallel", "arbitrary"),
            vmem_limit_bytes=vmem_limit,
        ),
    )(pred2d, true2d)


@functools.partial(jax.jit, static_argnames=("alpha", "use_secondary"))
def _mixed_loss_impl(y_pred, y_true, *, alpha, use_secondary):
    total = int(y_pred.size)
    pred_flat = y_pred.reshape(-1)
    true_flat = y_true.reshape(-1)

    isz_p = jnp.dtype(y_pred.dtype).itemsize
    isz_t = jnp.dtype(y_true.dtype).itemsize
    itemsize = max(isz_p, isz_t)

    # Dtype-aware sublane packing: 8 rows for f32, 16 for bf16, 32 for int8/fp8.
    if y_pred.dtype == y_true.dtype:
        sub = _SUBLANES * max(1, 4 // itemsize)
    else:
        sub = _SUBLANES

    num_splits = 2 if (_TPU_GEN is not None and _TPU_GEN >= 7) else 1
    block_bytes = (4 << 20) if (_TPU_GEN is not None and _TPU_GEN >= 6) else (2 << 20)

    lane_rows = total // _LANES                      # full 128-element rows
    rows_per_split = lane_rows // num_splits
    max_rows = max(sub, (block_bytes // (_LANES * itemsize)) // sub * sub)
    tile_rows = min(max_rows, rows_per_split // sub * sub)

    if tile_rows >= sub:
        n_inner = lane_rows // (tile_rows * num_splits)
        main_rows = n_inner * tile_rows * num_splits
    else:
        n_inner = 0
        main_rows = 0
    main_elems = main_rows * _LANES

    sq_sum = jnp.float32(0.0)
    ab_sum = jnp.float32(0.0)

    if main_elems > 0:
        # Tile-aligned prefix: pure reshape when already aligned (no copy),
        # otherwise a static prefix slice (still far cheaper than padding both
        # full arrays as before).
        pm = pred_flat if main_elems == total else pred_flat[:main_elems]
        tm = true_flat if main_elems == total else true_flat[:main_elems]
        pred2d = pm.reshape(main_rows, _LANES)
        true2d = tm.reshape(main_rows, _LANES)

        # Explicit VMEM budget: 2 inputs x 2 pipeline buffers + headroom for
        # the few-vreg loop temporaries and tiny resident outputs.
        tile_in_bytes = tile_rows * _LANES * (isz_p + isz_t)
        vmem_limit = int(min(64 << 20, 2 * tile_in_bytes + (8 << 20)))

        parts = _reduce_sums(
            pred2d, true2d,
            tile_rows=tile_rows, sub_rows=sub, n_inner=n_inner,
            num_splits=num_splits, compute_l1=use_secondary,
            vmem_limit=vmem_limit)
        sq_sum = sq_sum + jnp.sum(parts[0])
        if use_secondary:
            ab_sum = ab_sum + jnp.sum(parts[1])

    if main_elems < total:
        # TODO(synk): tail (< one grid pass worth of elements) reduced with
        # plain jnp; an in-kernel mask via a scalar-prefetched valid count
        # would avoid even this.
        dp = pred_flat[main_elems:].astype(jnp.float32)
        dt = true_flat[main_elems:].astype(jnp.float32)
        d = dp - dt
        sq_sum = sq_sum + jnp.sum(d * d)
        if use_secondary:
            ab_sum = ab_sum + jnp.sum(jnp.abs(d))

    n = jnp.float32(total)                           # true element count
    p = sq_sum / n                                   # MSELoss (mean)
    s = (ab_sum / n) if use_secondary else jnp.float32(0.0)
    m = p + jnp.float32(alpha) * s
    return {"primary": p, "secondary": s, "mixed": m}


class MixedLossPallas:
    """JAX/Pallas equivalent of MixedLoss(primary=MSE, secondary=L1)."""

    def __init__(self, alpha: float = 0.5, start_epoch: int = 0,
                 has_secondary: bool = True):
        self.alpha = float(alpha)
        self.start_epoch = int(start_epoch)
        self.current_epoch = 0
        self.training = True
        self.has_secondary = has_secondary

    def update_epoch(self, epoch: int) -> None:
        self.current_epoch = int(epoch)

    def train(self):
        self.training = True
        return self

    def eval(self):
        self.training = False
        return self

    def __call__(self, y_pred, y_true):
        # TODO(synk): the training/epoch gate is Python trace-time state (as in
        # the nn.Module); toggling it selects a different jit specialization.
        use_secondary = bool(
            self.has_secondary
            and self.training
            and (self.current_epoch >= self.start_epoch)
        )
        return _mixed_loss_impl(y_pred, y_true, alpha=self.alpha,
                                use_secondary=use_secondary)


if __name__ == "__main__":
    key = jax.random.PRNGKey(0)
    k1, k2 = jax.random.split(key)

    # Small NCHW prediction/target pair.
    B, C, H, W = 2, 4, 16, 16
    y_pred = jax.random.normal(k1, (B, C, H, W), dtype=jnp.float32)
    y_true = jax.random.normal(k2, (B, C, H, W), dtype=jnp.float32)

    loss_mod = MixedLossPallas(alpha=0.5, start_epoch=0)
    loss_mod.training = True
    loss_mod.update_epoch(0)

    out = loss_mod(y_pred, y_true)
    out = jax.block_until_ready(out)

    # Reference check in plain JAX.
    diff = (y_pred - y_true).astype(jnp.float32)
    p_ref = jnp.mean(diff * diff)
    s_ref = jnp.mean(jnp.abs(diff))
    m_ref = p_ref + 0.5 * s_ref
    assert jnp.allclose(out["primary"], p_ref, rtol=1e-5, atol=1e-6)
    assert jnp.allclose(out["secondary"], s_ref, rtol=1e-5, atol=1e-6)
    assert jnp.allclose(out["mixed"], m_ref, rtol=1e-5, atol=1e-6)

    print("KERNEL_OK")
</pallas_src>

<mosaic_0001>
module attributes {stable_mosaic.version = 11 : i64} {
  func.func @kernel(%arg0: i32, %arg1: i32, %arg2: memref<16x128xf32, #tpu.memory_space<vmem>>, %arg3: memref<16x128xf32, #tpu.memory_space<vmem>>, %arg4: memref<1x8x128xf32, #tpu.memory_space<vmem>>, %arg5: memref<1x8x128xf32, #tpu.memory_space<vmem>>) attributes {dimension_semantics = [#tpu.dimension_semantics<parallel>, #tpu.dimension_semantics<arbitrary>], iteration_bounds = array<i64: 1, 1>, scalar_prefetch = 0 : i64, scratch_operands = 0 : i64, tpu.core_type = #tpu.core_type<tc>, window_params = [{transform_indices = @transform_0, window_bounds = array<i64: 16, 128>}, {transform_indices = @transform_1, window_bounds = array<i64: 16, 128>}, {transform_indices = @transform_2, window_bounds = array<i64: 1, 8, 128>}, {transform_indices = @transform_3, window_bounds = array<i64: 1, 8, 128>}]} {
    %c0_i32 = arith.constant 0 : i32
    %0 = arith.cmpi eq, %arg1, %c0_i32 : i32
    %1 = arith.extui %0 : i1 to i32
    %c0_i32_0 = arith.constant 0 : i32
    %2 = arith.cmpi ne, %1, %c0_i32_0 : i32
    scf.if %2 {
      %cst_18 = arith.constant 0.000000e+00 : f32
      %38 = vector.broadcast %cst_18 : f32 to vector<1x8x128xf32>
      %c0_19 = arith.constant 0 : index
      %c0_20 = arith.constant 0 : index
      %c0_21 = arith.constant 0 : index
      %39 = vector.load %arg4[%c0_19, %c0_20, %c0_21] : memref<1x8x128xf32, #tpu.memory_space<vmem>>, vector<1x8x128xf32>
      tpu.vector_store %arg4[%c0_19, %c0_20, %c0_21], %38 {strides = array<i32>} : memref<1x8x128xf32, #tpu.memory_space<vmem>>, vector<1x8x128xf32>,
      %cst_22 = arith.constant 0.000000e+00 : f32
      %40 = vector.broadcast %cst_22 : f32 to vector<1x8x128xf32>
      %c0_23 = arith.constant 0 : index
      %c0_24 = arith.constant 0 : index
      %c0_25 = arith.constant 0 : index
      %41 = vector.load %arg5[%c0_23, %c0_24, %c0_25] : memref<1x8x128xf32, #tpu.memory_space<vmem>>, vector<1x8x128xf32>
      tpu.vector_store %arg5[%c0_23, %c0_24, %c0_25], %40 {strides = array<i32>} : memref<1x8x128xf32, #tpu.memory_space<vmem>>, vector<1x8x128xf32>,
    } else {
    }
    %cst = arith.constant 0.000000e+00 : f32
    %3 = vector.broadcast %cst : f32 to vector<8x128xf32>
    %c0_i32_1 = arith.constant 0 : i32
    %c8_i32 = arith.constant 8 : i32
    %4 = arith.muli %c0_i32_1, %c8_i32 : i32
    %5 = tpu.assume_multiple %4, 8 : i32
    %6 = arith.index_cast %5 : i32 to index
    %c0 = arith.constant 0 : index
    %7 = vector.load %arg2[%6, %c0] : memref<16x128xf32, #tpu.memory_space<vmem>>, vector<8x128xf32>
    %8 = arith.index_cast %5 : i32 to index
    %c0_2 = arith.constant 0 : index
    %9 = vector.load %arg3[%8, %c0_2] : memref<16x128xf32, #tpu.memory_space<vmem>>, vector<8x128xf32>
    %10 = arith.subf %7, %9 : vector<8x128xf32>
    %11 = arith.mulf %10, %10 : vector<8x128xf32>
    %12 = arith.addf %3, %11 : vector<8x128xf32>
    %13 = math.absf %10 : vector<8x128xf32>
    %14 = arith.addf %3, %13 : vector<8x128xf32>
    %c1_i32 = arith.constant 1 : i32
    %c8_i32_3 = arith.constant 8 : i32
    %15 = arith.muli %c1_i32, %c8_i32_3 : i32
    %16 = tpu.assume_multiple %15, 8 : i32
    %17 = arith.index_cast %16 : i32 to index
    %c0_4 = arith.constant 0 : index
    %18 = vector.load %arg2[%17, %c0_4] : memref<16x128xf32, #tpu.memory_space<vmem>>, vector<8x128xf32>
    %19 = arith.index_cast %16 : i32 to index
    %c0_5 = arith.constant 0 : index
    %20 = vector.load %arg3[%19, %c0_5] : memref<16x128xf32, #tpu.memory_space<vmem>>, vector<8x128xf32>
    %21 = arith.subf %18, %20 : vector<8x128xf32>
    %22 = arith.mulf %21, %21 : vector<8x128xf32>
    %23 = arith.addf %12, %22 : vector<8x128xf32>
    %24 = math.absf %21 : vector<8x128xf32>
    %25 = arith.addf %14, %24 : vector<8x128xf32>
    %c2_i32 = arith.constant 2 : i32
    %c0_6 = arith.constant 0 : index
    %c0_7 = arith.constant 0 : index
    %c0_8 = arith.constant 0 : index
    %26 = vector.load %arg4[%c0_6, %c0_7, %c0_8] : memref<1x8x128xf32, #tpu.memory_space<vmem>>, vector<1x8x128xf32>
    %27 = vector.shape_cast %26 : vector<1x8x128xf32> to vector<8x128xf32>
    %28 = arith.addf %27, %23 : vector<8x128xf32>
    %c0_9 = arith.constant 0 : index
    %c0_10 = arith.constant 0 : index
    %c0_11 = arith.constant 0 : index
    %29 = vector.load %arg4[%c0_9, %c0_10, %c0_11] : memref<1x8x128xf32, #tpu.memory_space<vmem>>, vector<1x8x128xf32>
    %30 = vector.shape_cast %29 : vector<1x8x128xf32> to vector<8x128xf32>
    %31 = vector.shape_cast %28 : vector<8x128xf32> to vector<1x8x128xf32>
    tpu.vector_store %arg4[%c0_9, %c0_10, %c0_11], %31 {strides = array<i32>} : memref<1x8x128xf32, #tpu.memory_space<vmem>>, vector<1x8x128xf32>,
    %c0_12 = arith.constant 0 : index
    %c0_13 = arith.constant 0 : index
    %c0_14 = arith.constant 0 : index
    %32 = vector.load %arg5[%c0_12, %c0_13, %c0_14] : memref<1x8x128xf32, #tpu.memory_space<vmem>>, vector<1x8x128xf32>
    %33 = vector.shape_cast %32 : vector<1x8x128xf32> to vector<8x128xf32>
    %34 = arith.addf %33, %25 : vector<8x128xf32>
    %c0_15 = arith.constant 0 : index
    %c0_16 = arith.constant 0 : index
    %c0_17 = arith.constant 0 : index
    %35 = vector.load %arg5[%c0_15, %c0_16, %c0_17] : memref<1x8x128xf32, #tpu.memory_space<vmem>>, vector<1x8x128xf32>
    %36 = vector.shape_cast %35 : vector<1x8x128xf32> to vector<8x128xf32>
    %37 = vector.shape_cast %34 : vector<8x128xf32> to vector<1x8x128xf32>
    tpu.vector_store %arg5[%c0_15, %c0_16, %c0_17], %37 {strides = array<i32>} : memref<1x8x128xf32, #tpu.memory_space<vmem>>, vector<1x8x128xf32>,
    return
  }
  func.func @transform_0(%arg0: i32, %arg1: i32) -> (i32, i32) {
    %c1_i32 = arith.constant 1 : i32
    %0 = arith.muli %arg0, %c1_i32 : i32
    %1 = arith.addi %0, %arg1 : i32
    %c0_i32 = arith.constant 0 : i32
    %c0_i32_0 = arith.constant 0 : i32
    return %1, %c0_i32 : i32, i32
  }
  func.func @transform_1(%arg0: i32, %arg1: i32) -> (i32, i32) {
    %c1_i32 = arith.constant 1 : i32
    %0 = arith.muli %arg0, %c1_i32 : i32
    %1 = arith.addi %0, %arg1 : i32
    %c0_i32 = arith.constant 0 : i32
    %c0_i32_0 = arith.constant 0 : i32
    return %1, %c0_i32 : i32, i32
  }
  func.func @transform_2(%arg0: i32, %arg1: i32) -> (i32, i32, i32) {
    %c0_i32 = arith.constant 0 : i32
    %c0_i32_0 = arith.constant 0 : i32
    %c0_i32_1 = arith.constant 0 : i32
    return %arg0, %c0_i32, %c0_i32_0 : i32, i32, i32
  }
  func.func @transform_3(%arg0: i32, %arg1: i32) -> (i32, i32, i32) {
    %c0_i32 = arith.constant 0 : i32
    %c0_i32_0 = arith.constant 0 : i32
    %c0_i32_1 = arith.constant 0 : i32
    return %arg0, %c0_i32, %c0_i32_0 : i32, i32, i32
  }
}

</mosaic_0001>

<bundles_post_ra>
// kernel: _mixed_loss_impl.1
= control target key start
LH: loop header
LB: loop body
LE: loop exit
PB: predicated region body
PF: predicated region fallthrough
CT: control target
= control target key end

     0   :  { %s146_s0 = inlined_call_operand.vmem [shape: f32[16,128], index: 0, kind: input, shape index: {}]   ;;  %s147_s1 = inlined_call_operand.vmem [shape: f32[16,128], index: 1, kind: input, shape index: {}]   ;;  %s148_s2 = inlined_call_operand.vmem [shape: f32[1,8,128], index: 2, kind: output, shape index: {0}]   ;;  %s149_s3 = inlined_call_operand.vmem [shape: f32[1,8,128], index: 3, kind: output, shape index: {1}]  }
   0x1   :  { %v63_v0 = vld [vmem:[%s146_s0] sm:$0xff]  ;;  %v105_v2 = vld [vmem:[%s146_s0 + $0x8] sm:$0xff] }
   0x2   :  { %v64_v1 = vld [vmem:[%s147_s1] sm:$0xff]  ;;  %v106_v4 = vld [vmem:[%s147_s1 + $0x8] sm:$0xff] }
   0x3   :  { %v65_v3 = vsub.f32 %v63_v0, %v64_v1  ;;  %v74_v5 = vsub.f32 %v105_v2, %v106_v4 }
   0x5   :  { %v66_v6 = vmul.f32 %v65_v3, %v65_v3  ;;  %v68_v7 = vand.u32 2147483647, %v65_v3  ;;  %v75_v8 = vmul.f32 %v74_v5, %v74_v5  ;;  %v77_v9 = vand.u32 2147483647, %v74_v5 }
   0x7   :  { %v76_v10 = vadd.f32 %v75_v8, %v66_v6  ;;  %v78_v11 = vadd.f32 %v77_v9, %v68_v7 }
   0x9   :  { %81 = vst [vmem:[%s148_s2] sm:$0xff] %v76_v10  ;;  %84 = vst [vmem:[%s149_s3] sm:$0xff] %v78_v11 }

</bundles_post_ra>
